<compile_context>
chip_gen: v7x
topology: tpu7x:2x2x1
jax: 0.10.0
libtpu: 0.0.40
codegen_flags: <defaults>
</compile_context>

<pallas_src>
import functools

import jax
import jax.numpy as jnp
from jax.experimental import pallas as pl
from jax.experimental.pallas import tpu as pltpu


# ------------------------------------------------------------ fused kernel --
def _fused_simseq_kernel(
    x_ref, w0_ref, b0_ref, alpha_ref, gamma_ref, beta_ref, w1_ref, b1_ref,
    out_ref, *, n_valid, eps,
):
    # ---- SIMLinear 0 (MXU): [Np, Dp] @ [Dp, Hp] + bias --------------------
    h = (
        jnp.dot(x_ref[...], w0_ref[...], preferred_element_type=jnp.float32)
        + b0_ref[...]
    )

    # ---- GraphNorm over the node axis (mask out zero-padded rows) ---------
    n_pad = h.shape[0]
    inv_n = 1.0 / float(n_valid)
    if n_valid == n_pad:
        mean = jnp.sum(h, axis=0, keepdims=True) * inv_n
        sub = h - alpha_ref[...] * mean
        var = jnp.sum(sub * sub, axis=0, keepdims=True) * inv_n
    else:
        row = jax.lax.broadcasted_iota(jnp.int32, (n_pad, 1), 0)
        valid = (row < n_valid).astype(jnp.float32)
        mean = jnp.sum(h * valid, axis=0, keepdims=True) * inv_n
        sub = h - alpha_ref[...] * mean
        var = jnp.sum((sub * sub) * valid, axis=0, keepdims=True) * inv_n
    gn = gamma_ref[...] * sub * jax.lax.rsqrt(var + eps) + beta_ref[...]

    # ---- Dropout: identity in eval mode ------------------------------------
    # ---- SIMLinear 1 (MXU): [Np, Hp] @ [Hp, Hp] + bias ---------------------
    out = (
        jnp.dot(gn, w1_ref[...], preferred_element_type=jnp.float32)
        + b1_ref[...]
    )
    out_ref[...] = out.astype(out_ref.dtype)


# ----------------------------------------------------------------- wrapper --
def _round_up(n, m):
    return ((n + m - 1) // m) * m


def _pad2(a, rows, cols):
    r, c = a.shape
    return jnp.pad(a, ((0, rows - r), (0, cols - c)))


def simseq_forward(x, params, eps=1e-5):
    """SIMSeq.forward for modlist = [SIMLinear, Dropout, GraphNorm, SIMLinear]."""
    N, D = x.shape
    H = params["w0"].shape[1]
    # TODO(synk): SIMLinear source code not in the reference; src pass-through assumed.

    # Pad to lane-dense (128) feature tiles and sublane-aligned (8) node rows.
    Np = max(_round_up(N, 8), 8)
    Dp = _round_up(D, 128)
    Hp = _round_up(H, 128)

    x_p = _pad2(x, Np, Dp)
    w0_p = _pad2(params["w0"], Dp, Hp)
    w1_p = _pad2(params["w1"], Hp, Hp)
    b0_p = _pad2(params["b0"].reshape(1, H), 1, Hp)
    b1_p = _pad2(params["b1"].reshape(1, H), 1, Hp)
    alpha_p = _pad2(params["alpha"].reshape(1, H), 1, Hp)
    gamma_p = _pad2(params["gamma"].reshape(1, H), 1, Hp)
    beta_p = _pad2(params["beta"].reshape(1, H), 1, Hp)

    # Whole fused working set is VMEM-resident; keep well under v7x's 64 MiB.
    footprint = 4 * (Np * Dp + Dp * Hp + Hp * Hp + Np * Hp + 5 * Hp)
    assert footprint < 24 * (1 << 20), (
        "fused SIMSeq working set exceeds the safe VMEM budget"
    )
    # TODO(synk): for very large N/H, switch to a node-tiled two-pass GraphNorm pipeline.

    vec_spec = pl.BlockSpec((1, Hp), lambda i: (0, 0))
    out_p = pl.pallas_call(
        functools.partial(_fused_simseq_kernel, n_valid=N, eps=eps),
        out_shape=jax.ShapeDtypeStruct((Np, Hp), x.dtype),
        grid=(1,),
        in_specs=[
            pl.BlockSpec((Np, Dp), lambda i: (0, 0)),  # x
            pl.BlockSpec((Dp, Hp), lambda i: (0, 0)),  # w0
            vec_spec,                                  # b0
            vec_spec,                                  # alpha
            vec_spec,                                  # gamma
            vec_spec,                                  # beta
            pl.BlockSpec((Hp, Hp), lambda i: (0, 0)),  # w1
            vec_spec,                                  # b1
        ],
        out_specs=pl.BlockSpec((Np, Hp), lambda i: (0, 0)),
        compiler_params=pltpu.CompilerParams(
            dimension_semantics=("arbitrary",),
            vmem_limit_bytes=min(max(8 * footprint, 16 << 20), 64 << 20),
        ),
    )(x_p, w0_p, b0_p, alpha_p, gamma_p, beta_p, w1_p, b1_p)

    return out_p[:N, :H]


# --------------------------------------------------------- pure-JAX reference
def _reference(x, params, eps=1e-5):
    h = x @ params["w0"] + params["b0"]
    mean = jnp.mean(h, axis=0, keepdims=True)
    sub = h - params["alpha"] * mean
    var = jnp.mean(sub * sub, axis=0, keepdims=True)
    gn = params["gamma"] * sub * jax.lax.rsqrt(var + eps) + params["beta"]
    return gn @ params["w1"] + params["b1"]


# -------------------------------------------------------------------- main --
if __name__ == "__main__":
    key = jax.random.PRNGKey(0)
    N, D, H = 16, 32, 32  # nodes, input features, hidden features

    kx, k0, k1 = jax.random.split(key, 3)
    x = jax.random.normal(kx, (N, D), jnp.float32)

    params = {
        "w0": jax.random.normal(k0, (D, H), jnp.float32) / jnp.sqrt(jnp.float32(D)),
        "b0": jnp.zeros((H,), jnp.float32),
        "alpha": jnp.ones((H,), jnp.float32),   # GraphNorm mean-scale
        "gamma": jnp.ones((H,), jnp.float32),   # GraphNorm weight
        "beta": jnp.zeros((H,), jnp.float32),   # GraphNorm bias
        "w1": jax.random.normal(k1, (H, H), jnp.float32) / jnp.sqrt(jnp.float32(H)),
        "b1": jnp.zeros((H,), jnp.float32),
    }

    out = simseq_forward(x, params)
    jax.block_until_ready(out)
    assert out.shape == (N, H)

    ref = _reference(x, params)
    assert jnp.allclose(out, ref, atol=1e-4, rtol=1e-4), "mismatch vs. reference"

    print("KERNEL_OK")
</pallas_src>

<mosaic_0001>
module attributes {stable_mosaic.version = 11 : i64} {
  func.func @_fused_simseq_kernel(%arg0: i32, %arg1: memref<16x128xf32, #tpu.memory_space<vmem>>, %arg2: memref<128x128xf32, #tpu.memory_space<vmem>>, %arg3: memref<1x128xf32, #tpu.memory_space<vmem>>, %arg4: memref<1x128xf32, #tpu.memory_space<vmem>>, %arg5: memref<1x128xf32, #tpu.memory_space<vmem>>, %arg6: memref<1x128xf32, #tpu.memory_space<vmem>>, %arg7: memref<128x128xf32, #tpu.memory_space<vmem>>, %arg8: memref<1x128xf32, #tpu.memory_space<vmem>>, %arg9: memref<16x128xf32, #tpu.memory_space<vmem>>) attributes {dimension_semantics = [#tpu.dimension_semantics<arbitrary>], iteration_bounds = array<i64: 1>, scalar_prefetch = 0 : i64, scratch_operands = 0 : i64, tpu.core_type = #tpu.core_type<tc>, window_params = [{pipeline_mode = #tpu.pipeline_mode<synchronous>, transform_indices = @transform_0, window_bounds = array<i64: 16, 128>}, {pipeline_mode = #tpu.pipeline_mode<synchronous>, transform_indices = @transform_1, window_bounds = array<i64: 128, 128>}, {pipeline_mode = #tpu.pipeline_mode<synchronous>, transform_indices = @transform_2, window_bounds = array<i64: 1, 128>}, {pipeline_mode = #tpu.pipeline_mode<synchronous>, transform_indices = @transform_3, window_bounds = array<i64: 1, 128>}, {pipeline_mode = #tpu.pipeline_mode<synchronous>, transform_indices = @transform_4, window_bounds = array<i64: 1, 128>}, {pipeline_mode = #tpu.pipeline_mode<synchronous>, transform_indices = @transform_5, window_bounds = array<i64: 1, 128>}, {pipeline_mode = #tpu.pipeline_mode<synchronous>, transform_indices = @transform_6, window_bounds = array<i64: 128, 128>}, {pipeline_mode = #tpu.pipeline_mode<synchronous>, transform_indices = @transform_7, window_bounds = array<i64: 1, 128>}, {pipeline_mode = #tpu.pipeline_mode<synchronous>, transform_indices = @transform_8, window_bounds = array<i64: 16, 128>}]} {
    %c0 = arith.constant 0 : index
    %c0_0 = arith.constant 0 : index
    %0 = vector.load %arg1[%c0, %c0_0] : memref<16x128xf32, #tpu.memory_space<vmem>>, vector<16x128xf32>
    %c0_1 = arith.constant 0 : index
    %c0_2 = arith.constant 0 : index
    %1 = vector.load %arg2[%c0_1, %c0_2] : memref<128x128xf32, #tpu.memory_space<vmem>>, vector<128x128xf32>
    %cst = arith.constant dense<0.000000e+00> : vector<16x128xf32>
    %2 = tpu.matmul %0, %1, %cst {dimension_numbers = #tpu.dot_dimension_numbers<[1], [0], [0], [1], [0, 0, 1, 1], [], []>} : vector<16x128xf32>, vector<128x128xf32>, vector<16x128xf32> -> vector<16x128xf32>
    %c0_3 = arith.constant 0 : index
    %c0_4 = arith.constant 0 : index
    %3 = vector.load %arg3[%c0_3, %c0_4] : memref<1x128xf32, #tpu.memory_space<vmem>>, vector<1x128xf32>
    %4 = vector.broadcast %3 : vector<1x128xf32> to vector<16x128xf32>
    %5 = arith.addf %2, %4 : vector<16x128xf32>
    %cst_5 = arith.constant dense<0.000000e+00> : vector<128xf32>
    %6 = vector.multi_reduction <add>, %5, %cst_5 [0] : vector<16x128xf32> to vector<128xf32>
    %7 = vector.shape_cast %6 : vector<128xf32> to vector<1x128xf32>
    %cst_6 = arith.constant 6.250000e-02 : f32
    %8 = vector.broadcast %cst_6 : f32 to vector<1x128xf32>
    %9 = arith.mulf %7, %8 : vector<1x128xf32>
    %c0_7 = arith.constant 0 : index
    %c0_8 = arith.constant 0 : index
    %10 = vector.load %arg4[%c0_7, %c0_8] : memref<1x128xf32, #tpu.memory_space<vmem>>, vector<1x128xf32>
    %11 = arith.mulf %10, %9 : vector<1x128xf32>
    %12 = vector.broadcast %11 : vector<1x128xf32> to vector<16x128xf32>
    %13 = arith.subf %5, %12 : vector<16x128xf32>
    %14 = arith.mulf %13, %13 : vector<16x128xf32>
    %cst_9 = arith.constant dense<0.000000e+00> : vector<128xf32>
    %15 = vector.multi_reduction <add>, %14, %cst_9 [0] : vector<16x128xf32> to vector<128xf32>
    %16 = vector.shape_cast %15 : vector<128xf32> to vector<1x128xf32>
    %cst_10 = arith.constant 6.250000e-02 : f32
    %17 = vector.broadcast %cst_10 : f32 to vector<1x128xf32>
    %18 = arith.mulf %16, %17 : vector<1x128xf32>
    %c0_11 = arith.constant 0 : index
    %c0_12 = arith.constant 0 : index
    %19 = vector.load %arg5[%c0_11, %c0_12] : memref<1x128xf32, #tpu.memory_space<vmem>>, vector<1x128xf32>
    %20 = vector.broadcast %19 : vector<1x128xf32> to vector<16x128xf32>
    %21 = arith.mulf %20, %13 : vector<16x128xf32>
    %cst_13 = arith.constant 9.99999974E-6 : f32
    %22 = vector.broadcast %cst_13 : f32 to vector<1x128xf32>
    %23 = arith.addf %18, %22 : vector<1x128xf32>
    %24 = math.rsqrt %23 : vector<1x128xf32>
    %25 = vector.broadcast %24 : vector<1x128xf32> to vector<16x128xf32>
    %26 = arith.mulf %21, %25 : vector<16x128xf32>
    %c0_14 = arith.constant 0 : index
    %c0_15 = arith.constant 0 : index
    %27 = vector.load %arg6[%c0_14, %c0_15] : memref<1x128xf32, #tpu.memory_space<vmem>>, vector<1x128xf32>
    %28 = vector.broadcast %27 : vector<1x128xf32> to vector<16x128xf32>
    %29 = arith.addf %26, %28 : vector<16x128xf32>
    %c0_16 = arith.constant 0 : index
    %c0_17 = arith.constant 0 : index
    %30 = vector.load %arg7[%c0_16, %c0_17] : memref<128x128xf32, #tpu.memory_space<vmem>>, vector<128x128xf32>
    %cst_18 = arith.constant dense<0.000000e+00> : vector<16x128xf32>
    %31 = tpu.matmul %29, %30, %cst_18 {dimension_numbers = #tpu.dot_dimension_numbers<[1], [0], [0], [1], [0, 0, 1, 1], [], []>} : vector<16x128xf32>, vector<128x128xf32>, vector<16x128xf32> -> vector<16x128xf32>
    %c0_19 = arith.constant 0 : index
    %c0_20 = arith.constant 0 : index
    %32 = vector.load %arg8[%c0_19, %c0_20] : memref<1x128xf32, #tpu.memory_space<vmem>>, vector<1x128xf32>
    %33 = vector.broadcast %32 : vector<1x128xf32> to vector<16x128xf32>
    %34 = arith.addf %31, %33 : vector<16x128xf32>
    %c0_21 = arith.constant 0 : index
    %c0_22 = arith.constant 0 : index
    %35 = vector.load %arg9[%c0_21, %c0_22] : memref<16x128xf32, #tpu.memory_space<vmem>>, vector<16x128xf32>
    tpu.vector_store %arg9[%c0_21, %c0_22], %34 {strides = array<i32>} : memref<16x128xf32, #tpu.memory_space<vmem>>, vector<16x128xf32>,
    return
  }
  func.func @transform_0(%arg0: i32) -> (i32, i32) {
    %c0_i32 = arith.constant 0 : i32
    %c0_i32_0 = arith.constant 0 : i32
    %c0_i32_1 = arith.constant 0 : i32
    return %c0_i32, %c0_i32_0 : i32, i32
  }
  func.func @transform_1(%arg0: i32) -> (i32, i32) {
    %c0_i32 = arith.constant 0 : i32
    %c0_i32_0 = arith.constant 0 : i32
    %c0_i32_1 = arith.constant 0 : i32
    return %c0_i32, %c0_i32_0 : i32, i32
  }
  func.func @transform_2(%arg0: i32) -> (i32, i32) {
    %c0_i32 = arith.constant 0 : i32
    %c0_i32_0 = arith.constant 0 : i32
    %c0_i32_1 = arith.constant 0 : i32
    return %c0_i32, %c0_i32_0 : i32, i32
  }
  func.func @transform_3(%arg0: i32) -> (i32, i32) {
    %c0_i32 = arith.constant 0 : i32
    %c0_i32_0 = arith.constant 0 : i32
    %c0_i32_1 = arith.constant 0 : i32
    return %c0_i32, %c0_i32_0 : i32, i32
  }
  func.func @transform_4(%arg0: i32) -> (i32, i32) {
    %c0_i32 = arith.constant 0 : i32
    %c0_i32_0 = arith.constant 0 : i32
    %c0_i32_1 = arith.constant 0 : i32
    return %c0_i32, %c0_i32_0 : i32, i32
  }
  func.func @transform_5(%arg0: i32) -> (i32, i32) {
    %c0_i32 = arith.constant 0 : i32
    %c0_i32_0 = arith.constant 0 : i32
    %c0_i32_1 = arith.constant 0 : i32
    return %c0_i32, %c0_i32_0 : i32, i32
  }
  func.func @transform_6(%arg0: i32) -> (i32, i32) {
    %c0_i32 = arith.constant 0 : i32
    %c0_i32_0 = arith.constant 0 : i32
    %c0_i32_1 = arith.constant 0 : i32
    return %c0_i32, %c0_i32_0 : i32, i32
  }
  func.func @transform_7(%arg0: i32) -> (i32, i32) {
    %c0_i32 = arith.constant 0 : i32
    %c0_i32_0 = arith.constant 0 : i32
    %c0_i32_1 = arith.constant 0 : i32
    return %c0_i32, %c0_i32_0 : i32, i32
  }
  func.func @transform_8(%arg0: i32) -> (i32, i32) {
    %c0_i32 = arith.constant 0 : i32
    %c0_i32_0 = arith.constant 0 : i32
    %c0_i32_1 = arith.constant 0 : i32
    return %c0_i32, %c0_i32_0 : i32, i32
  }
}

</mosaic_0001>

<bundles_post_ra>
// kernel: tpu_custom_call.1
= control target key start
LH: loop header
LB: loop body
LE: loop exit
PB: predicated region body
PF: predicated region fallthrough
CT: control target
= control target key end

     0   :  { %13 = vsyncpa [#allocation3], 0  ;;  %s748_s0 = inlined_call_operand.hbm [shape: f32[16,128], index: 0, kind: input, shape index: {}]   ;;  %s749_s1 = inlined_call_operand.hbm [shape: f32[128,128], index: 1, kind: input, shape index: {}]   ;;  %s750_s2 = inlined_call_operand.vmem [shape: f32[1,128], index: 2, kind: input, shape index: {}]   ;;  %s751_s3 = inlined_call_operand.vmem [shape: f32[1,128], index: 3, kind: input, shape index: {}]   ;;  %s752_s4 = inlined_call_operand.vmem [shape: f32[1,128], index: 4, kind: input, shape index: {}]   ;;  %s753_s5 = inlined_call_operand.vmem [shape: f32[1,128], index: 5, kind: input, shape index: {}]   ;;  %s754_s6 = inlined_call_operand.hbm [shape: f32[128,128], index: 6, kind: input, shape index: {}]   ;;  %s755_s7 = inlined_call_operand.vmem [shape: f32[1,128], index: 7, kind: input, shape index: {}]   ;;  %s756_s8 = inlined_call_operand.hbm [shape: f32[16,128], index: 8, kind: output, shape index: {}]  }
   0x1   :  { %14 = vsyncpa [#allocation6], 0 }
   0x2   :  { %15 = vsyncpa [#allocation4], 0  ;;  %s615_s27 = smov [#allocation5]   ;;  %s616_s29 = smov [#allocation2]  }
   0x3   :  { %s33_s28 = sshll.u32 %s615_s27, 4  ;;  %s21_s30 = sshll.u32 %s616_s29, 4  ;;  %s34_s28 = int_to_ptr.vmem [resolvable:$true] %s33_s28  ;;  %s666_s30 = int_to_ptr.vmem [resolvable:$true] %s21_s30 }
   0x4   :  { %s521_s11 = scalar_lea.hbm %s749_s1, 2048 }
   0x5   :  { %p522_p0 = scmp.ne.s32.totalorder %s749_s1, %s521_s11  ;;  %p525_p1 = scmp.lt.u32.totalorder %s521_s11, %s749_s1 }
   0x7   :  { %p527_p2 = pnand %p525_p1, %p522_p0 }
   0x9   :  { %530 = shalt.err (!%p527_p2)
}
   0xa   :  { %s531_s16 = scalar_lea.vmem %s34_s28, 2048  ;;  %p536_p4 = scmp.lt.s32.totalorder %s34_s28, %s34_s28 }
   0xb   :  { %p532_p3 = scmp.ne.s32.totalorder %s34_s28, %s531_s16  ;;  %p537_p5 = scmp.lt.s32.totalorder %s531_s16, %s531_s16 }
   0xd   :  { %p538_p6 = por %p537_p5, %p536_p4 }
   0xf   :  { %p539_p7 = pnand %p538_p6, %p532_p3 }
  0x11   :  { %542 = shalt.err (!%p539_p7)
}
  0x12   :  { %s617_s17 = smov 128   ;;  %s618_s18 = smov 8  }
  0x13   :  { %39 = dma.hbm_to_vmem [thread:$0]  %s749_s1, 2048, %s34_s28, [#allocation6], %s617_s17, %s617_s17, %s618_s18  }
  0x14   :  { %s543_s23 = scalar_lea.hbm %s748_s0, 256 }
  0x15   :  { %p544_p8 = scmp.ne.s32.totalorder %s748_s0, %s543_s23  ;;  %p547_p9 = scmp.lt.u32.totalorder %s543_s23, %s748_s0 }
  0x17   :  { %p549_p10 = pnand %p547_p9, %p544_p8 }
  0x19   :  { %552 = shalt.err (!%p549_p10)
}
  0x1a   :  { %s553_s29 = scalar_lea.vmem %s666_s30, 256  ;;  %p558_p12 = scmp.lt.s32.totalorder %s666_s30, %s666_s30 }
  0x1b   :  { %p554_p11 = scmp.ne.s32.totalorder %s666_s30, %s553_s29  ;;  %p559_p13 = scmp.lt.s32.totalorder %s553_s29, %s553_s29 }
  0x1d   :  { %p560_p0 = por %p559_p13, %p558_p12 }
  0x1f   :  { %p561_p1 = pnand %p560_p0, %p554_p11 }
  0x21   :  { %564 = shalt.err (!%p561_p1)
}
  0x22   :  { %27 = dma.hbm_to_vmem [thread:$0]  %s748_s0, 256, %s666_s30, [#allocation3], %s617_s17, %s617_s17, %s618_s18  }
  0x23   :  { %s619_s9 = smov [#allocation7]   ;;  %s565_s13 = scalar_lea.hbm %s754_s6, 2048 }
  0x24   :  { %s53_s10 = sshll.u32 %s619_s9, 4  ;;  %p566_p2 = scmp.ne.s32.totalorder %s754_s6, %s565_s13  ;;  %s54_s10 = int_to_ptr.vmem [resolvable:$true] %s53_s10 }
  0x25   :  { %p569_p3 = scmp.lt.u32.totalorder %s565_s13, %s754_s6 }
  0x27   :  { %p571_p4 = pnand %p569_p3, %p566_p2 }
  0x29   :  { %574 = shalt.err (!%p571_p4)
}
  0x2a   :  { %s575_s20 = scalar_lea.vmem %s54_s10, 2048  ;;  %p580_p6 = scmp.lt.s32.totalorder %s54_s10, %s54_s10 }
  0x2b   :  { %p576_p5 = scmp.ne.s32.totalorder %s54_s10, %s575_s20  ;;  %p581_p7 = scmp.lt.s32.totalorder %s575_s20, %s575_s20 }
  0x2d   :  { %p582_p8 = por %p581_p7, %p580_p6 }
  0x2f   :  { %p583_p9 = pnand %p582_p8, %p576_p5 }
  0x31   :  { %586 = shalt.err (!%p583_p9)
}
  0x32   :  { %59 = dma.hbm_to_vmem [thread:$0]  %s754_s6, 2048, %s54_s10, [#allocation6], %s617_s17, %s617_s17, %s618_s18  }
  0x33   :  { %609 = dma.done.wait [#allocation3], 256  }
  0x34   :  { %610 = vsyncadd [#allocation3], 4294967040 }
  0x35   :  { %611 = dma.done.wait [#allocation6], 4096  }
  0x36   :  { %612 = vsyncadd [#allocation6], 4294963200  ;;  %v73_v0 = vld [vmem:[#allocation5] sm:$0xff]  ;;  %v74_v1 = vld [vmem:[#allocation5 + $0x8] sm:$0xff]  ;;  %v182_v59 = vlaneseq  ;;  %s620_s29 = smov [#allocation8]  }
  0x37   :  { %v75_v2 = vld [vmem:[#allocation5 + $0x10] sm:$0xff]  ;;  %v449_v3 = vpack.c.bf16 %v74_v1, %v73_v0  ;;  %v76_v4 = vld [vmem:[#allocation5 + $0x18] sm:$0xff]  ;;  %v77_v6 = vld [vmem:[#allocation5 + $0x20] sm:$0xff]  ;;  %s326_s1 = sshll.u32 %s620_s29, 4  ;;  %s327_s1 = int_to_ptr.vmem [resolvable:$true] %s326_s1 }
  0x38   :  { %v453_v5 = vpack.c.bf16 %v76_v4, %v75_v2  ;;  %v78_v7 = vld [vmem:[#allocation5 + $0x28] sm:$0xff]  ;;  %v71_v9 = vld [vmem:[#allocation2] sm:$0xff]  ;;  %v80_v11 = vld [vmem:[#allocation5 + $0x38] sm:$0xff]  ;;  %v183_v62 = vshrl.u32 %v182_v59, 7  ;;  %p592_p11 = scmp.lt.s32.totalorder %s327_s1, %s327_s1 }
  0x39   :  { %450 = vmatprep.subr.bf16.mxu0 %v449_v3  ;;  %v457_v8 = vpack.c.bf16 %v78_v7, %v77_v6  ;;  %v79_v10 = vld [vmem:[#allocation5 + $0x30] sm:$0xff]  ;;  %411 = vmatprep.mubr.f32.mxu0 %v71_v9  ;;  %v81_v13 = vld [vmem:[#allocation5 + $0x40] sm:$0xff]  ;;  %v82_v14 = vld [vmem:[#allocation5 + $0x48] sm:$0xff] }
  0x3a   :  { %452 = vmatpush3.bf16.msra.mxu0 %v449_v3  ;;  %v461_v12 = vpack.c.bf16 %v80_v11, %v79_v10  ;;  %v465_v15 = vpack.c.bf16 %v82_v14, %v81_v13  ;;  %v83_v16 = vld [vmem:[#allocation5 + $0x50] sm:$0xff]  ;;  %v84_v17 = vld [vmem:[#allocation5 + $0x58] sm:$0xff]  ;;  %v85_v19 = vld [vmem:[#allocation5 + $0x60] sm:$0xff]  ;;  %v184_v2 = vsub.s32 0, %v183_v62 }
  0x3b   :  { %454 = vmatprep.subr.bf16.mxu0 %v453_v5  ;;  %v469_v18 = vpack.c.bf16 %v84_v17, %v83_v16  ;;  %v86_v20 = vld [vmem:[#allocation5 + $0x68] sm:$0xff]  ;;  %v87_v22 = vld [vmem:[#allocation5 + $0x70] sm:$0xff]  ;;  %v88_v23 = vld [vmem:[#allocation5 + $0x78] sm:$0xff] }
  0x3c   :  { %v473_v21 = vpack.c.bf16 %v86_v20, %v85_v19  ;;  %v477_v24 = vpack.c.bf16 %v88_v23, %v87_v22  ;;  %v72_v25 = vld [vmem:[#allocation2 + $0x8] sm:$0xff]  ;;  %v221_v26 = vld [vmem:[#allocation7] sm:$0xff]  ;;  %v222_v27 = vld [vmem:[#allocation7 + $0x8] sm:$0xff] }
  0x3d   :  { %v481_v28 = vpack.c.bf16 %v222_v27, %v221_v26  ;;  %v223_v29 = vld [vmem:[#allocation7 + $0x10] sm:$0xff]  ;;  %v224_v30 = vld [vmem:[#allocation7 + $0x18] sm:$0xff]  ;;  %v225_v32 = vld [vmem:[#allocation7 + $0x20] sm:$0xff] }
  0x3e   :  { %456 = vmatpush3.bf16.msra.mxu0 %v453_v5  ;;  %v485_v31 = vpack.c.bf16 %v224_v30, %v223_v29  ;;  %v226_v33 = vld [vmem:[#allocation7 + $0x28] sm:$0xff]  ;;  %v227_v35 = vld [vmem:[#allocation7 + $0x30] sm:$0xff]  ;;  %v228_v36 = vld [vmem:[#allocation7 + $0x38] sm:$0xff] }
  0x3f   :  { %458 = vmatprep.subr.bf16.mxu0 %v457_v8  ;;  %482 = vmatprep.subr.bf16.mxu1 %v481_v28  ;;  %v489_v34 = vpack.c.bf16 %v226_v33, %v225_v32  ;;  %v493_v37 = vpack.c.bf16 %v228_v36, %v227_v35  ;;  %v229_v38 = vld [vmem:[#allocation7 + $0x40] sm:$0xff]  ;;  %v230_v39 = vld [vmem:[#allocation7 + $0x48] sm:$0xff]  ;;  %v231_v40 = vld [vmem:[#allocation7 + $0x50] sm:$0xff] }
  0x40   :  { %484 = vmatpush3.bf16.msra.mxu1 %v481_v28  ;;  %v497_v41 = vpack.c.bf16 %v230_v39, %v229_v38  ;;  %v232_v42 = vld [vmem:[#allocation7 + $0x58] sm:$0xff]  ;;  %v233_v44 = vld [vmem:[#allocation7 + $0x60] sm:$0xff]  ;;  %v234_v45 = vld [vmem:[#allocation7 + $0x68] sm:$0xff] }
  0x41   :  { %486 = vmatprep.subr.bf16.mxu1 %v485_v31  ;;  %v501_v43 = vpack.c.bf16 %v232_v42, %v231_v40  ;;  %v505_v46 = vpack.c.bf16 %v234_v45, %v233_v44  ;;  %v235_v47 = vld [vmem:[#allocation7 + $0x70] sm:$0xff]  ;;  %v236_v48 = vld [vmem:[#allocation7 + $0x78] sm:$0xff] }
  0x42   :  { %460 = vmatpush3.bf16.msra.mxu0 %v457_v8  ;;  %v509_v49 = vpack.c.bf16 %v236_v48, %v235_v47  ;;  %v339_v50 = vld [vmem:[%s750_s2] ss:$0 sm:$0xff] }
  0x43   :  { %462 = vmatprep.subr.bf16.mxu0 %v461_v12  ;;  %v179_v0 = vld [vmem:[%s751_s3] sm:$0x1] }
  0x44   :  { %488 = vmatpush3.bf16.msra.mxu1 %v485_v31  ;;  %v341_v22 = vld [vmem:[%s753_s5] ss:$0 sm:$0xff] }
  0x45   :  { %490 = vmatprep.subr.bf16.mxu1 %v489_v34  ;;  %v342_v27 = vld [vmem:[%s755_s7] ss:$0 sm:$0xff] }
  0x46   :  { %464 = vmatpush3.bf16.msra.mxu0 %v461_v12 }
  0x47   :  { %466 = vmatprep.subr.bf16.mxu0 %v465_v15 }
  0x48   :  { %492 = vmatpush3.bf16.msra.mxu1 %v489_v34 }
  0x49   :  { %494 = vmatprep.subr.bf16.mxu1 %v493_v37 }
  0x4a   :  { %468 = vmatpush3.bf16.msra.mxu0 %v465_v15 }
  0x4b   :  { %470 = vmatprep.subr.bf16.mxu0 %v469_v18 }
  0x4c   :  { %496 = vmatpush3.bf16.msra.mxu1 %v493_v37 }
  0x4d   :  { %498 = vmatprep.subr.bf16.mxu1 %v497_v41 }
  0x4e   :  { %472 = vmatpush3.bf16.msra.mxu0 %v469_v18  ;;  %v340_v18 = vld [vmem:[%s752_s4] ss:$0 sm:$0xff]  ;;  %s587_s4 = scalar_lea.vmem %s327_s1, 256 }
  0x4f   :  { %474 = vmatprep.subr.bf16.mxu0 %v473_v21  ;;  %p588_p10 = scmp.ne.s32.totalorder %s327_s1, %s587_s4  ;;  %p593_p12 = scmp.lt.s32.totalorder %s587_s4, %s587_s4 }
  0x50   :  { %500 = vmatpush3.bf16.msra.mxu1 %v497_v41 }
  0x51   :  { %502 = vmatprep.subr.bf16.mxu1 %v501_v43  ;;  %p594_p13 = por %p593_p12, %p592_p11 }
  0x52   :  { %476 = vmatpush3.bf16.msra.mxu0 %v473_v21 }
  0x53   :  { %478 = vmatprep.subr.bf16.mxu0 %v477_v24  ;;  %p595_p0 = pnand %p594_p13, %p588_p10 }
  0x54   :  { %504 = vmatpush3.bf16.msra.mxu1 %v501_v43 }
  0x55   :  { %506 = vmatprep.subr.bf16.mxu1 %v505_v46 }
  0x56   :  { %480 = vmatpush3.bf16.msra.mxu0 %v477_v24 }
  0x58   :  { %508 = vmatpush3.bf16.msra.mxu1 %v505_v46 }
  0x59   :  { %412 = vmatmul.mubr.f32.vlgmr.msra.gmra.mrb[0].mxu0 %v72_v25  ;;  %510 = vmatprep.subr.bf16.mxu1 %v509_v49 }
  0x5c   :  { %512 = vmatpush3.bf16.msra.mxu1 %v509_v49 }
 0x12c   :  { %v413_v51 = vpop.f32.mrb[0].mxu0 }
 0x12d   :  { %v168_v52 = vadd.f32 %v413_v51, %v339_v50  ;;  %v162_v53 = vpop.f32.mrb[1].mxu0 }
 0x12e   :  { %v163_v54 = vadd.f32 %v339_v50, %v162_v53 }
 0x130   :  { %v171_v55 = vadd.f32 %v168_v52, %v163_v54 }
 0x132   :  { %v172_v56 = vrot.slane %v171_v55, 4 }
 0x134   :  { %v173_v57 = vadd.f32 %v172_v56, %v171_v55 }
 0x136   :  { %v174_v58 = vrot.slane %v173_v57, 2 }
 0x138   :  { %v175_v60 = vadd.f32 %v174_v58, %v173_v57 }
 0x13a   :  { %v176_v61 = vrot.slane %v175_v60, 1 }
 0x13c   :  { %v177_v63 = vadd.f32 %v176_v61, %v175_v60 }
 0x13e   :  { %v178_v1 = vmul.f32 0.0625, %v177_v63 }
 0x140   :  { %v180_v3 = vmul.f32 %v179_v0, %v178_v1 }
 0x142   :  { %v185_v4 = vrot.slane %v180_v3, %v184_v2 }
 0x144   :  { %v187_v5 = vsub.f32 %v163_v54, %v185_v4  ;;  %v188_v6 = vsub.f32 %v168_v52, %v185_v4 }
 0x146   :  { %v189_v7 = vmul.f32 %v187_v5, %v187_v5  ;;  %v190_v8 = vmul.f32 %v188_v6, %v188_v6  ;;  %v206_v19 = vmul.f32 %v340_v18, %v187_v5  ;;  %v207_v20 = vmul.f32 %v340_v18, %v188_v6 }
 0x148   :  { %v191_v9 = vadd.f32 %v190_v8, %v189_v7 }
 0x14a   :  { %v192_v10 = vrot.slane %v191_v9, 4 }
 0x14c   :  { %v193_v11 = vadd.f32 %v192_v10, %v191_v9 }
 0x14e   :  { %v194_v12 = vrot.slane %v193_v11, 2 }
 0x150   :  { %v195_v13 = vadd.f32 %v194_v12, %v193_v11 }
 0x152   :  { %v196_v14 = vrot.slane %v195_v13, 1 }
 0x154   :  { %v197_v15 = vadd.f32 %v196_v14, %v195_v13 }
 0x156   :  { %v198_v16 = vmul.f32 0.0625, %v197_v15 }
 0x158   :  { %v208_v17 = vadd.f32 1e-05, %v198_v16 }
 0x15a   :  { %519 = vrsqrt.f32 %v208_v17 }
 0x164   :  { %v520_v21 = vpop.eup %519 }
 0x165   :  { %v210_v23 = vmul.f32 %v520_v21, %v206_v19  ;;  %v211_v24 = vmul.f32 %v520_v21, %v207_v20 }
 0x167   :  { %v219_v25 = vadd.f32 %v341_v22, %v210_v23  ;;  %v220_v26 = vadd.f32 %v341_v22, %v211_v24 }
 0x169   :  { %446 = vmatprep.mubr.f32.mxu1 %v219_v25 }
 0x16a   :  { %447 = vmatmul.mubr.f32.vlgmr.msra.gmra.mrb[0].mxu1 %v220_v26 }
 0x23d   :  { %v448_v28 = vpop.f32.mrb[0].mxu1 }
 0x23e   :  { %v316_v29 = vadd.f32 %v448_v28, %v342_v27  ;;  %v310_v30 = vpop.f32.mrb[1].mxu1 }
 0x23f   :  { %v311_v31 = vadd.f32 %v342_v27, %v310_v30 }
 0x240   :  { %320 = vst [vmem:[#allocation8 + $0x8] sm:$0xff] %v316_v29 }
 0x241   :  { %319 = vst [vmem:[#allocation8] sm:$0xff] %v311_v31 }
 0x242   :  { %598 = shalt.err (!%p595_p0)
}
 0x243   :  { %s599_s7 = scalar_lea.hbm %s756_s8, 256 }
 0x244   :  { %p600_p1 = scmp.ne.s32.totalorder %s756_s8, %s599_s7  ;;  %p603_p2 = scmp.lt.u32.totalorder %s599_s7, %s756_s8 }
 0x246   :  { %p605_p3 = pnand %p603_p2, %p600_p1 }
 0x248   :  { %608 = shalt.err (!%p605_p3)
}
 0x249   :  { %332 = dma.vmem_to_hbm [thread:$0]  %s327_s1, 256, %s756_s8, [#allocation4], %s617_s17, %s617_s17, %s618_s18  }
 0x24a   :  { %613 = dma.done.wait [#allocation4], 256  }
 0x24b   :  { %614 = vsyncadd [#allocation4], 4294967040 }
 0x24c   :  { %336 = vsyncpa [#allocation3], 1 }
 0x24d   :  { %337 = vsyncpa [#allocation6], 1 }
 0x24e   :  { %338 = vsyncpa [#allocation4], 1 }

</bundles_post_ra>
